<compile_context>
chip_gen: v6e
topology: v6e:2x2x1
jax: 0.10.0
libtpu: 0.0.40
codegen_flags: <defaults>
</compile_context>

<pallas_src>
import functools

import jax
import jax.numpy as jnp
from jax.experimental import pallas as pl
from jax.experimental.pallas import tpu as pltpu


LANE = 128
ROW_PAD = 512                    # pad N to a multiple of this (keeps tiles big)
TM_TARGET = 512                  # row tile
TK_TARGET = 4096                 # reduction (columns-of-A) tile
RESIDENT_HW_LIMIT = 12 << 20     # resident HW (x2 buffers) kept <= 24 MiB
VMEM_CAP = 48 << 20


def _round_up(v, m):
    return ((v + m - 1) // m) * m


def _pick_tile(n_pad, target):
    """Largest multiple of 128 <= target that divides n_pad (n_pad % 128 == 0)."""
    t = min(target, n_pad)
    t -= t % LANE
    while n_pad % t:
        t -= LANE
    return t


def _pad2d(x, rows, cols):
    r, c = x.shape
    return jnp.pad(x, ((0, rows - r), (0, cols - c)))


# ---------------------------------------------------------------------------
# Kernel 1: feature transform   HW' = d^{-1/2} * (H @ W)
#   (row-tiled, W resident; f32 H cast to bf16 in-kernel)
# ---------------------------------------------------------------------------
def _linear_kernel(h_ref, w_ref, dinv_ref, o_ref):
    hw = jnp.dot(
        h_ref[...].astype(jnp.bfloat16), w_ref[...],
        preferred_element_type=jnp.float32,
    )
    o_ref[...] = (hw * dinv_ref[...]).astype(o_ref.dtype)


def linear_transform(h, w_bf16, d_inv_sqrt, *, tm=TM_TARGET):
    n_pad, f_in = h.shape
    f_out = w_bf16.shape[1]
    tm = _pick_tile(n_pad, tm)

    vmem = (2 * tm * f_in * h.dtype.itemsize   # double-buffered H tiles
            + 2 * f_in * f_out * 2             # resident W (bf16)
            + 2 * tm * f_out * 2               # output tiles (bf16)
            + tm * f_in * 2                    # in-kernel bf16 cast temp
            + 2 * tm * 4                       # d^{-1/2} row blocks
            + (6 << 20))                       # headroom
    vmem_limit = int(min(max(vmem, 16 << 20), VMEM_CAP))

    return pl.pallas_call(
        _linear_kernel,
        out_shape=jax.ShapeDtypeStruct((n_pad, f_out), jnp.bfloat16),
        grid_spec=pltpu.PrefetchScalarGridSpec(
            num_scalar_prefetch=0,
            grid=(n_pad // tm,),
            in_specs=[
                pl.BlockSpec((tm, f_in), lambda i: (i, 0)),
                pl.BlockSpec((f_in, f_out), lambda i: (0, 0)),
                pl.BlockSpec((tm, 1), lambda i: (i, 0)),
            ],
            out_specs=pl.BlockSpec((tm, f_out), lambda i: (i, 0)),
        ),
        compiler_params=pltpu.CompilerParams(
            dimension_semantics=("parallel",),
            vmem_limit_bytes=vmem_limit,
        ),
    )(h, w_bf16, d_inv_sqrt)


# ---------------------------------------------------------------------------
# Kernel 2: aggregation   out = act(d^{-1/2} * ((A+I) @ HW') + b)
#   grid = (N/tm rows [parallel], N/tk K-steps [arbitrary, last])
#   Output f32 block is the accumulator (resident across K).
# ---------------------------------------------------------------------------
def _aggregate_kernel(a_ref, hw_ref, b_ref, dinv_ref, o_ref, *,
                      apply_relu, tk, resident_hw):
    k = pl.program_id(1)

    @pl.when(k == 0)
    def _():
        o_ref[...] = jnp.zeros_like(o_ref)

    a = a_ref[...].astype(jnp.bfloat16)   # exact: entries are 0/1
    if resident_hw:
        start = pl.multiple_of(k * tk, tk)
        hw = hw_ref[pl.ds(start, tk), :]
    else:
        hw = hw_ref[...]
    o_ref[...] += jnp.dot(a, hw, preferred_element_type=jnp.float32)

    @pl.when(k == pl.num_programs(1) - 1)
    def _():
        z = o_ref[...] * dinv_ref[...] + b_ref[...]
        if apply_relu:
            z = jnp.maximum(z, 0.0)
        o_ref[...] = z


def aggregate(a_int8, hw_bf16, b, d_inv_sqrt, *, apply_relu,
              tm=TM_TARGET, tk=TK_TARGET):
    n_pad = a_int8.shape[0]
    f_out = hw_bf16.shape[1]
    tm = _pick_tile(n_pad, tm)
    tk = _pick_tile(n_pad, tk)
    b2d = b.reshape(1, f_out).astype(jnp.float32)

    hw_resident_bytes = 2 * n_pad * f_out * 2      # incl. pipeline double buffer
    resident_hw = hw_resident_bytes <= 2 * RESIDENT_HW_LIMIT
    if resident_hw:
        hw_spec = pl.BlockSpec((n_pad, f_out), lambda i, k: (0, 0))
        hw_bytes = hw_resident_bytes
    else:
        hw_spec = pl.BlockSpec((tk, f_out), lambda i, k: (k, 0))
        hw_bytes = 2 * tk * f_out * 2

    vmem = (2 * tm * tk * 1            # double-buffered int8 A tiles
            + hw_bytes
            + 2 * tm * f_out * 4       # resident f32 output/accumulator block
            + tm * tk * 2              # in-kernel bf16 cast temp of the A tile
            + 2 * (tm * 4 + f_out * 4)
            + (6 << 20))               # headroom
    vmem_limit = int(min(max(vmem, 16 << 20), VMEM_CAP))

    kernel = functools.partial(_aggregate_kernel, apply_relu=apply_relu,
                               tk=tk, resident_hw=resident_hw)
    return pl.pallas_call(
        kernel,
        out_shape=jax.ShapeDtypeStruct((n_pad, f_out), jnp.float32),
        grid_spec=pltpu.PrefetchScalarGridSpec(
            num_scalar_prefetch=0,
            grid=(n_pad // tm, n_pad // tk),
            in_specs=[
                pl.BlockSpec((tm, tk), lambda i, k: (i, k)),
                hw_spec,
                pl.BlockSpec((1, f_out), lambda i, k: (0, 0)),
                pl.BlockSpec((tm, 1), lambda i, k: (i, 0)),
            ],
            out_specs=pl.BlockSpec((tm, f_out), lambda i, k: (i, 0)),
        ),
        compiler_params=pltpu.CompilerParams(
            dimension_semantics=("parallel", "arbitrary"),
            vmem_limit_bytes=vmem_limit,
        ),
    )(a_int8, hw_bf16, b2d, d_inv_sqrt)


def gcn_layer(a_int8, d_inv_sqrt, h, w, b, *, apply_relu):
    hw = linear_transform(h, w.astype(jnp.bfloat16), d_inv_sqrt)
    return aggregate(a_int8, hw, b, d_inv_sqrt, apply_relu=apply_relu)


# ---------------------------------------------------------------------------
# Glue: exact (A+I)/D^{-1/2} factoring + deterministic parameter init
# ---------------------------------------------------------------------------
def build_adjacency(edge_index, num_nodes, n_pad):
    """(A + I) as a padded dense int8 0/1 matrix, plus D^{-1/2} as (n_pad,1) f32."""
    src = edge_index[0].astype(jnp.int32)
    dst = edge_index[1].astype(jnp.int32)
    a = jnp.zeros((n_pad, n_pad), jnp.int8)
    a = a.at[src, dst].set(1)
    a = a.at[dst, src].set(1)                 # undirected
    idx = jnp.arange(num_nodes, dtype=jnp.int32)
    a = a.at[idx, idx].set(1)                 # self loops (exact, dedup'd)
    # TODO(synk): differs slightly from PyG gcn_norm when edge_index already
    # contains duplicates / self-loops with weights (we dedup to 0/1).
    deg = jnp.sum(a, axis=1, dtype=jnp.int32).astype(jnp.float32)
    d_inv_sqrt = jnp.where(deg > 0, jax.lax.rsqrt(deg), 0.0)
    return a, d_inv_sqrt.reshape(n_pad, 1)


def init_params(key, in_dim, hidden_dim, out_dim):
    """Glorot-uniform weights, zero biases (matches GCNConv defaults)."""
    k1, k2 = jax.random.split(key)

    def glorot(k, fan_in, fan_out):
        limit = jnp.sqrt(6.0 / (fan_in + fan_out))
        return jax.random.uniform(k, (fan_in, fan_out), jnp.float32, -limit, limit)

    return {
        "w1": glorot(k1, in_dim, hidden_dim),
        "b1": jnp.zeros((hidden_dim,), jnp.float32),
        "w2": glorot(k2, hidden_dim, out_dim),
        "b2": jnp.zeros((out_dim,), jnp.float32),
    }


# ---------------------------------------------------------------------------
# GAE_f forward: encoder(x, edge_index) -> list of per-layer representations
# ---------------------------------------------------------------------------
def gae_f_forward(params, x, edge_index):
    n, f_in = x.shape
    hidden = params["w1"].shape[1]
    f_out = params["w2"].shape[1]

    n_pad = _round_up(n, ROW_PAD)             # pad to the row-tile granularity
    f_in_pad = _round_up(f_in, LANE)
    hid_pad = _round_up(hidden, LANE)
    f_out_pad = _round_up(f_out, LANE)

    a_int8, d_inv_sqrt = build_adjacency(edge_index, n, n_pad)

    x_pad = _pad2d(x.astype(jnp.float32), n_pad, f_in_pad)
    w1_pad = _pad2d(params["w1"], f_in_pad, hid_pad)
    b1_pad = jnp.pad(params["b1"], (0, hid_pad - hidden))
    w2_pad = _pad2d(params["w2"], hid_pad, f_out_pad)
    b2_pad = jnp.pad(params["b2"], (0, f_out_pad - f_out))

    h1_pad = gcn_layer(a_int8, d_inv_sqrt, x_pad, w1_pad, b1_pad, apply_relu=True)
    h2_pad = gcn_layer(a_int8, d_inv_sqrt, h1_pad, w2_pad, b2_pad, apply_relu=False)

    h1 = h1_pad[:n, :hidden]
    h2 = h2_pad[:n, :f_out]
    return [h1, h2]  # encoder returns list; z[-1] == h2

# TODO(synk): decoder / MSE train_step path not exercised here (forward() only
# calls the encoder); the decoder would be one more linear_transform kernel.
# TODO(synk): for genuinely sparse graphs a block-sparse (A+I) with
# PrefetchScalarGridSpec data-dependent index_maps would skip zero tiles;
# the dense padded int8 path is kept for generality.


if __name__ == "__main__":
    key = jax.random.PRNGKey(0)
    kx, kp = jax.random.split(key)

    # Small deterministic graph: 16 nodes on a ring, 32 input features.
    num_nodes, in_dim, hidden_dim, out_dim = 16, 32, 32, 32
    x = jax.random.normal(kx, (num_nodes, in_dim), jnp.float32)
    src = jnp.arange(num_nodes, dtype=jnp.int32)
    dst = (src + 1) % num_nodes
    edge_index = jnp.stack([src, dst], axis=0)  # [2, E]

    params = init_params(kp, in_dim, hidden_dim, out_dim)

    outs = gae_f_forward(params, x, edge_index)
    outs = [jax.block_until_ready(o) for o in outs]

    # Plain-JAX f32 reference of the same encoder (bf16 MXU operands in the
    # kernels -> loose tolerance).
    a01, dinv = build_adjacency(edge_index, num_nodes, num_nodes)
    d = dinv[:, 0]
    a_hat = a01.astype(jnp.float32) * d[:, None] * d[None, :]
    ref1 = jnp.maximum(a_hat @ x @ params["w1"] + params["b1"], 0.0)
    ref2 = a_hat @ ref1 @ params["w2"] + params["b2"]

    assert outs[0].shape == (num_nodes, hidden_dim)
    assert outs[1].shape == (num_nodes, out_dim)
    assert jnp.allclose(outs[0], ref1, atol=5e-2, rtol=5e-2)
    assert jnp.allclose(outs[1], ref2, atol=5e-2, rtol=5e-2)

    print("KERNEL_OK")
</pallas_src>

<mosaic_0001>
module attributes {stable_mosaic.version = 11 : i64} {
  func.func @_linear_kernel(%arg0: i32, %arg1: memref<512x128xf32, #tpu.memory_space<vmem>>, %arg2: memref<128x128xbf16, #tpu.memory_space<vmem>>, %arg3: memref<512x1xf32, #tpu.memory_space<vmem>>, %arg4: memref<512x128xbf16, #tpu.memory_space<vmem>>) attributes {dimension_semantics = [#tpu.dimension_semantics<parallel>], iteration_bounds = array<i64: 1>, scalar_prefetch = 0 : i64, scratch_operands = 0 : i64, tpu.core_type = #tpu.core_type<tc>, window_params = [{transform_indices = @transform_0, window_bounds = array<i64: 512, 128>}, {pipeline_mode = #tpu.pipeline_mode<synchronous>, transform_indices = @transform_1, window_bounds = array<i64: 128, 128>}, {transform_indices = @transform_2, window_bounds = array<i64: 512, 1>}, {transform_indices = @transform_3, window_bounds = array<i64: 512, 128>}]} {
    %c0 = arith.constant 0 : index
    %c0_0 = arith.constant 0 : index
    %0 = vector.load %arg1[%c0, %c0_0] : memref<512x128xf32, #tpu.memory_space<vmem>>, vector<512x128xf32>
    %1 = arith.truncf %0 : vector<512x128xf32> to vector<512x128xbf16>
    %c0_1 = arith.constant 0 : index
    %c0_2 = arith.constant 0 : index
    %2 = vector.load %arg2[%c0_1, %c0_2] : memref<128x128xbf16, #tpu.memory_space<vmem>>, vector<128x128xbf16>
    %cst = arith.constant dense<0.000000e+00> : vector<512x128xf32>
    %3 = tpu.matmul %1, %2, %cst {dimension_numbers = #tpu.dot_dimension_numbers<[1], [0], [0], [1], [0, 0, 1, 1], [], []>} : vector<512x128xbf16>, vector<128x128xbf16>, vector<512x128xf32> -> vector<512x128xf32>
    %c0_3 = arith.constant 0 : index
    %c0_4 = arith.constant 0 : index
    %4 = vector.load %arg3[%c0_3, %c0_4] : memref<512x1xf32, #tpu.memory_space<vmem>>, vector<512x1xf32>
    %5 = vector.broadcast %4 : vector<512x1xf32> to vector<512x128xf32>
    %6 = arith.mulf %3, %5 : vector<512x128xf32>
    %7 = arith.truncf %6 : vector<512x128xf32> to vector<512x128xbf16>
    %c0_5 = arith.constant 0 : index
    %c0_6 = arith.constant 0 : index
    %8 = vector.load %arg4[%c0_5, %c0_6] : memref<512x128xbf16, #tpu.memory_space<vmem>>, vector<512x128xbf16>
    tpu.vector_store %arg4[%c0_5, %c0_6], %7 {strides = array<i32>} : memref<512x128xbf16, #tpu.memory_space<vmem>>, vector<512x128xbf16>,
    return
  }
  func.func @transform_0(%arg0: i32) -> (i32, i32) {
    %c0_i32 = arith.constant 0 : i32
    %c0_i32_0 = arith.constant 0 : i32
    return %arg0, %c0_i32 : i32, i32
  }
  func.func @transform_1(%arg0: i32) -> (i32, i32) {
    %c0_i32 = arith.constant 0 : i32
    %c0_i32_0 = arith.constant 0 : i32
    %c0_i32_1 = arith.constant 0 : i32
    return %c0_i32, %c0_i32_0 : i32, i32
  }
  func.func @transform_2(%arg0: i32) -> (i32, i32) {
    %c0_i32 = arith.constant 0 : i32
    %c0_i32_0 = arith.constant 0 : i32
    return %arg0, %c0_i32 : i32, i32
  }
  func.func @transform_3(%arg0: i32) -> (i32, i32) {
    %c0_i32 = arith.constant 0 : i32
    %c0_i32_0 = arith.constant 0 : i32
    return %arg0, %c0_i32 : i32, i32
  }
}

</mosaic_0001>

<bundles_post_ra>
// kernel: tpu_custom_call.1
= control target key start
LH: loop header
LB: loop body
LE: loop exit
PB: predicated region body
PF: predicated region fallthrough
CT: control target
= control target key end

     0   :  { %8 = vsyncpa [#allocation3], 0  ;;  %s2318_s0 = inlined_call_operand.vmem [shape: f32[512,128], index: 0, kind: input, shape index: {}]   ;;  %s2319_s1 = inlined_call_operand.hbm [shape: bf16[128,128], index: 1, kind: input, shape index: {}]   ;;  %s2320_s2 = inlined_call_operand.vmem [shape: f32[512,1], index: 2, kind: input, shape index: {}]   ;;  %s2321_s3 = inlined_call_operand.hbm [shape: bf16[512,128], index: 3, kind: output, shape index: {}]  }
   0x1   :  { %9 = vsyncpa [#allocation4], 0  ;;  %s1786_s12 = smov [#allocation2]  }
   0x2   :  { %s17_s13 = sshll.u32 %s1786_s12, 4  ;;  %s18_s13 = int_to_ptr.vmem [resolvable:$true] %s17_s13 }
   0x3   :  { %s1750_s14 = scalar_lea.vmem %s18_s13, 1024  ;;  %p1755_p1 = scmp.lt.s32.totalorder %s18_s13, %s18_s13 }
   0x4   :  { %p1751_p0 = scmp.ne.s32.totalorder %s18_s13, %s1750_s14  ;;  %p1756_p2 = scmp.lt.s32.totalorder %s1750_s14, %s1750_s14 }
   0x6   :  { %p1757_p3 = por %p1756_p2, %p1755_p1 }
   0x8   :  { %p1758_p4 = pnand %p1757_p3, %p1751_p0 }
   0xa   :  { %1761 = shalt.err (!%p1758_p4)
}
   0xb   :  { %s1787_s15 = smov 64   ;;  %s1788_s16 = smov 4  }
   0xc   :  { %23 = dma.hbm_to_vmem [thread:$0]  %s2319_s1, 1024, %s18_s13, [#allocation3], %s1787_s15, %s1787_s15, %s1788_s16  }
   0xd   :  { %1782 = dma.done.wait [#allocation3], 1024  }
   0xe   :  { %1783 = vsyncadd [#allocation3], 4294966272  ;;  %v1789_v0 = vmov 0   ;;  %v481_v1 = vld [vmem:[%s2320_s2 + $0x10] sm:$0xff]  ;;  %v479_v2 = vld [vmem:[%s2320_s2] sm:$0xff] }
   0xf   :  { %1733 = vset.pattern.permute.xlu1 %v1789_v0  ;;  %1732 = vset.pattern.permute.xlu0 %v1789_v0  ;;  %v1734_v3 = vld [vmem:[#allocation2 + $0x38] sm:$0xff]   ;;  %v480_v5 = vld [vmem:[%s2320_s2 + $0x8] sm:$0xff]  ;;  %v1735_v6 = vld [vmem:[#allocation2 + $0x30] sm:$0xff]  }
  0x10   :  { %555 = vperm.xlu1 %1733, %v481_v1   ;;  %545 = vperm.xlu0 %1732, %v479_v2   ;;  %v482_v4 = vld [vmem:[%s2320_s2 + $0x18] sm:$0xff]  ;;  %v484_v7 = vld [vmem:[%s2320_s2 + $0x28] sm:$0xff]  ;;  %v483_v8 = vld [vmem:[%s2320_s2 + $0x20] sm:$0xff] }
  0x11   :  { %1631 = vmatprep.subr.bf16.mxu0 %v1734_v3  ;;  %1711 = vmatprep.subr.bf16.mxu1 %v1734_v3  ;;  %v1736_v9 = vld [vmem:[#allocation2 + $0x28] sm:$0xff]   ;;  %v486_v10 = vld [vmem:[%s2320_s2 + $0x38] sm:$0xff]  ;;  %v485_v11 = vld [vmem:[%s2320_s2 + $0x30] sm:$0xff] }
  0x12   :  { %1632 = vmatpush3.bf16.msra.mxu0 %v1734_v3  ;;  %1719 = vmatpush3.bf16.msra.mxu1 %v1734_v3  ;;  %v1737_v12 = vld [vmem:[#allocation2 + $0x20] sm:$0xff]   ;;  %v488_v13 = vld [vmem:[%s2320_s2 + $0x48] sm:$0xff]  ;;  %v1738_v15 = vld [vmem:[#allocation2 + $0x18] sm:$0xff]  }
  0x13   :  { %1633 = vmatprep.subr.bf16.mxu0 %v1735_v6  ;;  %1712 = vmatprep.subr.bf16.mxu1 %v1735_v6  ;;  %v487_v14 = vld [vmem:[%s2320_s2 + $0x40] sm:$0xff]  ;;  %v31_v17 = vld [vmem:[%s2318_s0 + $0x8] sm:$0xff]  ;;  %v490_v22 = vld [vmem:[%s2320_s2 + $0x58] sm:$0xff] }
  0x14   :  { %560 = vperm.xlu1 %1733, %v482_v4   ;;  %550 = vperm.xlu0 %1732, %v480_v5   ;;  %v30_v16 = vld [vmem:[%s2318_s0] sm:$0xff]  ;;  %v63_v20 = vld [vmem:[%s2318_s0 + $0x108] sm:$0xff]  ;;  %v489_v23 = vld [vmem:[%s2320_s2 + $0x50] sm:$0xff] }
  0x15   :  { %v62_v18 = vld [vmem:[%s2318_s0 + $0x100] sm:$0xff]  ;;  %v94_v19 = vpack.c.bf16 %v31_v17, %v30_v16  ;;  %v1739_v24 = vld [vmem:[#allocation2 + $0x10] sm:$0xff]   ;;  %v492_v25 = vld [vmem:[%s2320_s2 + $0x68] sm:$0xff] }
  0x16   :  { %1634 = vmatpush3.bf16.msra.mxu0 %v1735_v6  ;;  %1720 = vmatpush3.bf16.msra.mxu1 %v1735_v6  ;;  %v110_v21 = vpack.c.bf16 %v63_v20, %v62_v18  ;;  %v491_v26 = vld [vmem:[%s2320_s2 + $0x60] sm:$0xff]  ;;  %v1740_v27 = vld [vmem:[#allocation2 + $0x8] sm:$0xff]   ;;  %v494_v28 = vld [vmem:[%s2320_s2 + $0x78] sm:$0xff] }
  0x17   :  { %1635 = vmatprep.subr.bf16.mxu0 %v1736_v9  ;;  %1713 = vmatprep.subr.bf16.mxu1 %v1736_v9  ;;  %v493_v29 = vld [vmem:[%s2320_s2 + $0x70] sm:$0xff]  ;;  %v1741_v30 = vld [vmem:[#allocation2] sm:$0xff]   ;;  %v33_v32 = vld [vmem:[%s2318_s0 + $0x18] sm:$0xff] }
  0x18   :  { %570 = vperm.xlu1 %1733, %v484_v7   ;;  %565 = vperm.xlu0 %1732, %v483_v8   ;;  %v32_v31 = vld [vmem:[%s2318_s0 + $0x10] sm:$0xff]  ;;  %v65_v34 = vld [vmem:[%s2318_s0 + $0x118] sm:$0xff]  ;;  %v34_v35 = vld [vmem:[%s2318_s0 + $0x20] sm:$0xff] }
  0x19   :  { %1647 = vmatprep.mubr.bf16.mxu0 %v94_v19  ;;  %1679 = vmatprep.mubr.bf16.mxu1 %v110_v21  ;;  %v64_v33 = vld [vmem:[%s2318_s0 + $0x110] sm:$0xff]  ;;  %v35_v36 = vld [vmem:[%s2318_s0 + $0x28] sm:$0xff]  ;;  %v66_v37 = vld [vmem:[%s2318_s0 + $0x120] sm:$0xff]  ;;  %v95_v41 = vpack.c.bf16 %v33_v32, %v32_v31 }
  0x1a   :  { %1636 = vmatpush3.bf16.msra.mxu0 %v1736_v9  ;;  %1721 = vmatpush3.bf16.msra.mxu1 %v1736_v9  ;;  %v67_v38 = vld [vmem:[%s2318_s0 + $0x128] sm:$0xff]  ;;  %v495_v40 = vld [vmem:[%s2320_s2 + $0x80] sm:$0xff]  ;;  %v111_v42 = vpack.c.bf16 %v65_v34, %v64_v33  ;;  %v96_v43 = vpack.c.bf16 %v35_v36, %v34_v35  ;;  %v498_v45 = vld [vmem:[%s2320_s2 + $0x98] sm:$0xff] }
  0x1b   :  { %1637 = vmatprep.subr.bf16.mxu0 %v1737_v12  ;;  %1714 = vmatprep.subr.bf16.mxu1 %v1737_v12  ;;  %v496_v39 = vld [vmem:[%s2320_s2 + $0x88] sm:$0xff]  ;;  %v112_v44 = vpack.c.bf16 %v67_v38, %v66_v37  ;;  %v497_v46 = vld [vmem:[%s2320_s2 + $0x90] sm:$0xff]  ;;  %v37_v48 = vld [vmem:[%s2318_s0 + $0x38] sm:$0xff] }
  0x1c   :  { %580 = vperm.xlu1 %1733, %v486_v10   ;;  %575 = vperm.xlu0 %1732, %v485_v11   ;;  %v36_v47 = vld [vmem:[%s2318_s0 + $0x30] sm:$0xff]  ;;  %v69_v50 = vld [vmem:[%s2318_s0 + $0x138] sm:$0xff]  ;;  %v38_v51 = vld [vmem:[%s2318_s0 + $0x40] sm:$0xff] }
  0x1d   :  { %v68_v49 = vld [vmem:[%s2318_s0 + $0x130] sm:$0xff]  ;;  %v39_v52 = vld [vmem:[%s2318_s0 + $0x48] sm:$0xff]  ;;  %v70_v53 = vld [vmem:[%s2318_s0 + $0x140] sm:$0xff]  ;;  %v97_v57 = vpack.c.bf16 %v37_v48, %v36_v47 }
  0x1e   :  { %1638 = vmatpush3.bf16.msra.mxu0 %v1737_v12  ;;  %1722 = vmatpush3.bf16.msra.mxu1 %v1737_v12  ;;  %v71_v54 = vld [vmem:[%s2318_s0 + $0x148] sm:$0xff]  ;;  %v499_v56 = vld [vmem:[%s2320_s2 + $0xa0] sm:$0xff]  ;;  %v113_v58 = vpack.c.bf16 %v69_v50, %v68_v49  ;;  %v98_v59 = vpack.c.bf16 %v39_v52, %v38_v51  ;;  %v502_v61 = vld [vmem:[%s2320_s2 + $0xb8] sm:$0xff] }
  0x1f   :  { %1639 = vmatprep.subr.bf16.mxu0 %v1738_v15  ;;  %1715 = vmatprep.subr.bf16.mxu1 %v1738_v15  ;;  %v500_v55 = vld [vmem:[%s2320_s2 + $0xa8] sm:$0xff]  ;;  %v114_v60 = vpack.c.bf16 %v71_v54, %v70_v53  ;;  %v501_v62 = vld [vmem:[%s2320_s2 + $0xb0] sm:$0xff]  ;;  %v41_v0 = vld [vmem:[%s2318_s0 + $0x58] sm:$0xff] }
  0x20   :  { %590 = vperm.xlu1 %1733, %v488_v13   ;;  %585 = vperm.xlu0 %1732, %v487_v14   ;;  %v40_v63 = vld [vmem:[%s2318_s0 + $0x50] sm:$0xff]  ;;  %v73_v2 = vld [vmem:[%s2318_s0 + $0x158] sm:$0xff]  ;;  %v42_v3 = vld [vmem:[%s2318_s0 + $0x60] sm:$0xff] }
  0x21   :  { %v72_v1 = vld [vmem:[%s2318_s0 + $0x150] sm:$0xff]  ;;  %v43_v4 = vld [vmem:[%s2318_s0 + $0x68] sm:$0xff]  ;;  %v74_v5 = vld [vmem:[%s2318_s0 + $0x160] sm:$0xff]  ;;  %v99_v9 = vpack.c.bf16 %v41_v0, %v40_v63 }
  0x22   :  { %1640 = vmatpush3.bf16.msra.mxu0 %v1738_v15  ;;  %1723 = vmatpush3.bf16.msra.mxu1 %v1738_v15  ;;  %v75_v6 = vld [vmem:[%s2318_s0 + $0x168] sm:$0xff]  ;;  %v503_v8 = vld [vmem:[%s2320_s2 + $0xc0] sm:$0xff]  ;;  %v115_v10 = vpack.c.bf16 %v73_v2, %v72_v1  ;;  %v100_v11 = vpack.c.bf16 %v43_v4, %v42_v3  ;;  %v506_v13 = vld [vmem:[%s2320_s2 + $0xd8] sm:$0xff] }
  0x23   :  { %1641 = vmatprep.subr.bf16.mxu0 %v1739_v24  ;;  %1716 = vmatprep.subr.bf16.mxu1 %v1739_v24  ;;  %v504_v7 = vld [vmem:[%s2320_s2 + $0xc8] sm:$0xff]  ;;  %v116_v12 = vpack.c.bf16 %v75_v6, %v74_v5  ;;  %v505_v14 = vld [vmem:[%s2320_s2 + $0xd0] sm:$0xff]  ;;  %v45_v16 = vld [vmem:[%s2318_s0 + $0x78] sm:$0xff] }
  0x24   :  { %600 = vperm.xlu1 %1733, %v490_v22   ;;  %595 = vperm.xlu0 %1732, %v489_v23   ;;  %v44_v15 = vld [vmem:[%s2318_s0 + $0x70] sm:$0xff]  ;;  %v77_v18 = vld [vmem:[%s2318_s0 + $0x178] sm:$0xff]  ;;  %v46_v19 = vld [vmem:[%s2318_s0 + $0x80] sm:$0xff] }
  0x25   :  { %v76_v17 = vld [vmem:[%s2318_s0 + $0x170] sm:$0xff]  ;;  %v47_v20 = vld [vmem:[%s2318_s0 + $0x88] sm:$0xff]  ;;  %v78_v21 = vld [vmem:[%s2318_s0 + $0x180] sm:$0xff] }
  0x26   :  { %1642 = vmatpush3.bf16.msra.mxu0 %v1739_v24  ;;  %1724 = vmatpush3.bf16.msra.mxu1 %v1739_v24  ;;  %v79_v22 = vld [vmem:[%s2318_s0 + $0x188] sm:$0xff]  ;;  %v507_v24 = vld [vmem:[%s2320_s2 + $0xe0] sm:$0xff]  ;;  %v48_v31 = vld [vmem:[%s2318_s0 + $0x90] sm:$0xff] }
  0x27   :  { %1643 = vmatprep.subr.bf16.mxu0 %v1740_v27  ;;  %1717 = vmatprep.subr.bf16.mxu1 %v1740_v27  ;;  %v508_v23 = vld [vmem:[%s2320_s2 + $0xe8] sm:$0xff]  ;;  %v49_v32 = vld [vmem:[%s2318_s0 + $0x98] sm:$0xff]  ;;  %v80_v33 = vld [vmem:[%s2318_s0 + $0x190] sm:$0xff] }
  0x28   :  { %610 = vperm.xlu1 %1733, %v492_v25   ;;  %605 = vperm.xlu0 %1732, %v491_v26   ;;  %v101_v25 = vpack.c.bf16 %v45_v16, %v44_v15  ;;  %v117_v26 = vpack.c.bf16 %v77_v18, %v76_v17  ;;  %v81_v34 = vld [vmem:[%s2318_s0 + $0x198] sm:$0xff]  ;;  %v50_v35 = vld [vmem:[%s2318_s0 + $0xa0] sm:$0xff]  ;;  %v51_v36 = vld [vmem:[%s2318_s0 + $0xa8] sm:$0xff] }
  0x29   :  { %v82_v37 = vld [vmem:[%s2318_s0 + $0x1a0] sm:$0xff]  ;;  %v83_v38 = vld [vmem:[%s2318_s0 + $0x1a8] sm:$0xff]  ;;  %v52_v47 = vld [vmem:[%s2318_s0 + $0xb0] sm:$0xff] }
  0x2a   :  { %1644 = vmatpush3.bf16.msra.mxu0 %v1740_v27  ;;  %1725 = vmatpush3.bf16.msra.mxu1 %v1740_v27  ;;  %v102_v27 = vpack.c.bf16 %v47_v20, %v46_v19  ;;  %v53_v48 = vld [vmem:[%s2318_s0 + $0xb8] sm:$0xff]  ;;  %v84_v49 = vld [vmem:[%s2318_s0 + $0x1b0] sm:$0xff]  ;;  %v54_v51 = vld [vmem:[%s2318_s0 + $0xc0] sm:$0xff] }
  0x2b   :  { %1645 = vmatprep.subr.bf16.mxu0 %v1741_v30  ;;  %1718 = vmatprep.subr.bf16.mxu1 %v1741_v30  ;;  %v85_v50 = vld [vmem:[%s2318_s0 + $0x1b8] sm:$0xff]  ;;  %v55_v52 = vld [vmem:[%s2318_s0 + $0xc8] sm:$0xff]  ;;  %v86_v53 = vld [vmem:[%s2318_s0 + $0x1c0] sm:$0xff] }
  0x2c   :  { %620 = vperm.xlu1 %1733, %v494_v28   ;;  %615 = vperm.xlu0 %1732, %v493_v29   ;;  %v118_v28 = vpack.c.bf16 %v79_v22, %v78_v21  ;;  %v510_v29 = vld [vmem:[%s2320_s2 + $0xf8] sm:$0xff]  ;;  %v87_v54 = vld [vmem:[%s2318_s0 + $0x1c8] sm:$0xff]  ;;  %v56_v63 = vld [vmem:[%s2318_s0 + $0xd0] sm:$0xff] }
  0x2d   :  { %v57_v0 = vld [vmem:[%s2318_s0 + $0xd8] sm:$0xff]  ;;  %v88_v1 = vld [vmem:[%s2318_s0 + $0x1d0] sm:$0xff]  ;;  %v58_v3 = vld [vmem:[%s2318_s0 + $0xe0] sm:$0xff] }
  0x2e   :  { %1646 = vmatpush3.bf16.msra.mxu0 %v1741_v30  ;;  %1726 = vmatpush3.bf16.msra.mxu1 %v1741_v30  ;;  %v509_v30 = vld [vmem:[%s2320_s2 + $0xf0] sm:$0xff]  ;;  %v89_v2 = vld [vmem:[%s2318_s0 + $0x1d8] sm:$0xff]  ;;  %v59_v4 = vld [vmem:[%s2318_s0 + $0xe8] sm:$0xff] }
  0x2f   :  { %v90_v5 = vld [vmem:[%s2318_s0 + $0x1e0] sm:$0xff]  ;;  %v91_v6 = vld [vmem:[%s2318_s0 + $0x1e8] sm:$0xff]  ;;  %v60_v15 = vld [vmem:[%s2318_s0 + $0xf0] sm:$0xff] }
  0x30   :  { %630 = vperm.xlu1 %1733, %v496_v39   ;;  %625 = vperm.xlu0 %1732, %v495_v40   ;;  %v512_v39 = vld [vmem:[%s2320_s2 + $0x108] sm:$0xff]  ;;  %v511_v40 = vld [vmem:[%s2320_s2 + $0x100] sm:$0xff]  ;;  %v61_v16 = vld [vmem:[%s2318_s0 + $0xf8] sm:$0xff] }
  0x31   :  { %1648 = vmatmul.mubr.bf16.vlgmr.msra.gmra.mxu0 %v95_v41  ;;  %1680 = vmatmul.mubr.bf16.vlgmr.msra.gmra.mxu1 %v111_v42  ;;  %v103_v41 = vpack.c.bf16 %v49_v32, %v48_v31  ;;  %v119_v42 = vpack.c.bf16 %v81_v34, %v80_v33  ;;  %v92_v17 = vld [vmem:[%s2318_s0 + $0x1f0] sm:$0xff]  ;;  %v93_v18 = vld [vmem:[%s2318_s0 + $0x1f8] sm:$0xff]  ;;  %v524_v19 = vld [vmem:[%s2320_s2 + $0x168] sm:$0xff]  ;;  %v109_v21 = vpack.c.bf16 %v61_v16, %v60_v15 }
  0x32   :  { %1651 = vmatprep.mubr.bf16.mxu0 %v96_v43  ;;  %1683 = vmatprep.mubr.bf16.mxu1 %v112_v44  ;;  %v104_v43 = vpack.c.bf16 %v51_v36, %v50_v35  ;;  %v120_v44 = vpack.c.bf16 %v83_v38, %v82_v37  ;;  %v523_v20 = vld [vmem:[%s2320_s2 + $0x160] sm:$0xff]  ;;  %v125_v22 = vpack.c.bf16 %v93_v18, %v92_v17  ;;  %v534_v31 = vld [vmem:[%s2320_s2 + $0x1b8] sm:$0xff]  ;;  %v533_v32 = vld [vmem:[%s2320_s2 + $0x1b0] sm:$0xff] }
  0x33   :  { %v536_v33 = vld [vmem:[%s2320_s2 + $0x1c8] sm:$0xff]  ;;  %v535_v34 = vld [vmem:[%s2320_s2 + $0x1c0] sm:$0xff]  ;;  %v538_v35 = vld [vmem:[%s2320_s2 + $0x1d8] sm:$0xff] }
  0x34   :  { %640 = vperm.xlu1 %1733, %v498_v45   ;;  %635 = vperm.xlu0 %1732, %v497_v46   ;;  %v514_v45 = vld [vmem:[%s2320_s2 + $0x118] sm:$0xff]  ;;  %v513_v46 = vld [vmem:[%s2320_s2 + $0x110] sm:$0xff]  ;;  %v540_v37 = vld [vmem:[%s2320_s2 + $0x1e8] sm:$0xff] }
  0x35   :  { %v537_v36 = vld [vmem:[%s2320_s2 + $0x1d0] sm:$0xff]  ;;  %v539_v38 = vld [vmem:[%s2320_s2 + $0x1e0] sm:$0xff] }
  0x38   :  { %650 = vperm.xlu1 %1733, %v500_v55   ;;  %645 = vperm.xlu0 %1732, %v499_v56   ;;  %v516_v55 = vld [vmem:[%s2320_s2 + $0x128] sm:$0xff]  ;;  %v515_v56 = vld [vmem:[%s2320_s2 + $0x120] sm:$0xff] }
  0x39   :  { %1652 = vmatmul.mubr.bf16.gmra.mxu0 %v97_v57  ;;  %1684 = vmatmul.mubr.bf16.gmra.mxu1 %v113_v58  ;;  %v105_v57 = vpack.c.bf16 %v53_v48, %v52_v47  ;;  %v121_v58 = vpack.c.bf16 %v85_v50, %v84_v49 }
  0x3a   :  { %1655 = vmatprep.mubr.bf16.mxu0 %v98_v59  ;;  %1687 = vmatprep.mubr.bf16.mxu1 %v114_v60  ;;  %v106_v59 = vpack.c.bf16 %v55_v52, %v54_v51  ;;  %v122_v60 = vpack.c.bf16 %v87_v54, %v86_v53 }
  0x3c   :  { %660 = vperm.xlu1 %1733, %v502_v61   ;;  %655 = vperm.xlu0 %1732, %v501_v62   ;;  %v518_v61 = vld [vmem:[%s2320_s2 + $0x138] sm:$0xff]  ;;  %v517_v62 = vld [vmem:[%s2320_s2 + $0x130] sm:$0xff] }
  0x40   :  { %670 = vperm.xlu1 %1733, %v504_v7   ;;  %665 = vperm.xlu0 %1732, %v503_v8   ;;  %v520_v7 = vld [vmem:[%s2320_s2 + $0x148] sm:$0xff]  ;;  %v519_v8 = vld [vmem:[%s2320_s2 + $0x140] sm:$0xff] }
  0x41   :  { %1656 = vmatmul.mubr.bf16.gmra.mxu0 %v99_v9  ;;  %1688 = vmatmul.mubr.bf16.gmra.mxu1 %v115_v10  ;;  %v107_v9 = vpack.c.bf16 %v57_v0, %v56_v63  ;;  %v123_v10 = vpack.c.bf16 %v89_v2, %v88_v1 }
  0x42   :  { %1659 = vmatprep.mubr.bf16.mxu0 %v100_v11  ;;  %1691 = vmatprep.mubr.bf16.mxu1 %v116_v12  ;;  %v108_v11 = vpack.c.bf16 %v59_v4, %v58_v3  ;;  %v124_v12 = vpack.c.bf16 %v91_v6, %v90_v5 }
  0x44   :  { %680 = vperm.xlu1 %1733, %v506_v13   ;;  %675 = vperm.xlu0 %1732, %v505_v14   ;;  %v522_v13 = vld [vmem:[%s2320_s2 + $0x158] sm:$0xff]  ;;  %v521_v14 = vld [vmem:[%s2320_s2 + $0x150] sm:$0xff] }
  0x48   :  { %690 = vperm.xlu1 %1733, %v508_v23   ;;  %685 = vperm.xlu0 %1732, %v507_v24   ;;  %v526_v23 = vld [vmem:[%s2320_s2 + $0x178] sm:$0xff]  ;;  %v525_v24 = vld [vmem:[%s2320_s2 + $0x170] sm:$0xff] }
  0x49   :  { %1660 = vmatmul.mubr.bf16.gmra.mxu0 %v101_v25  ;;  %1692 = vmatmul.mubr.bf16.gmra.mxu1 %v117_v26  ;;  %v528_v25 = vld [vmem:[%s2320_s2 + $0x188] sm:$0xff]  ;;  %v527_v26 = vld [vmem:[%s2320_s2 + $0x180] sm:$0xff] }
  0x4a   :  { %1663 = vmatprep.mubr.bf16.mxu0 %v102_v27  ;;  %1695 = vmatprep.mubr.bf16.mxu1 %v118_v28  ;;  %v530_v27 = vld [vmem:[%s2320_s2 + $0x198] sm:$0xff]  ;;  %v529_v28 = vld [vmem:[%s2320_s2 + $0x190] sm:$0xff] }
  0x4c   :  { %700 = vperm.xlu1 %1733, %v510_v29   ;;  %695 = vperm.xlu0 %1732, %v509_v30   ;;  %v532_v29 = vld [vmem:[%s2320_s2 + $0x1a8] sm:$0xff]  ;;  %v531_v30 = vld [vmem:[%s2320_s2 + $0x1a0] sm:$0xff] }
  0x50   :  { %710 = vperm.xlu1 %1733, %v512_v39   ;;  %705 = vperm.xlu0 %1732, %v511_v40   ;;  %v542_v39 = vld [vmem:[%s2320_s2 + $0x1f8] sm:$0xff]  ;;  %v541_v40 = vld [vmem:[%s2320_s2 + $0x1f0] sm:$0xff]  ;;  %s1790_s2 = smov [#allocation5]  }
  0x51   :  { %1664 = vmatmul.mubr.bf16.gmra.mxu0 %v103_v41  ;;  %1696 = vmatmul.mubr.bf16.gmra.mxu1 %v119_v42  ;;  %s1252_s11 = sshll.u32 %s1790_s2, 4  ;;  %s1253_s11 = int_to_ptr.vmem [resolvable:$true] %s1252_s11 }
  0x52   :  { %1667 = vmatprep.mubr.bf16.mxu0 %v104_v43  ;;  %1699 = vmatprep.mubr.bf16.mxu1 %v120_v44  ;;  %s1762_s12 = scalar_lea.vmem %s1253_s11, 4096  ;;  %p1767_p6 = scmp.lt.s32.totalorder %s1253_s11, %s1253_s11 }
  0x53   :  { %p1763_p5 = scmp.ne.s32.totalorder %s1253_s11, %s1762_s12  ;;  %p1768_p7 = scmp.lt.s32.totalorder %s1762_s12, %s1762_s12 }
  0x54   :  { %720 = vperm.xlu1 %1733, %v514_v45   ;;  %715 = vperm.xlu0 %1732, %v513_v46  }
  0x55   :  { %p1769_p8 = por %p1768_p7, %p1767_p6 }
  0x57   :  { %p1770_p9 = pnand %p1769_p8, %p1763_p5 }
  0x58   :  { %730 = vperm.xlu1 %1733, %v516_v55   ;;  %725 = vperm.xlu0 %1732, %v515_v56  }
  0x59   :  { %1668 = vmatmul.mubr.bf16.gmra.mxu0 %v105_v57  ;;  %1700 = vmatmul.mubr.bf16.gmra.mxu1 %v121_v58 }
  0x5a   :  { %1671 = vmatprep.mubr.bf16.mxu0 %v106_v59  ;;  %1703 = vmatprep.mubr.bf16.mxu1 %v122_v60 }
  0x5c   :  { %740 = vperm.xlu1 %1733, %v518_v61   ;;  %735 = vperm.xlu0 %1732, %v517_v62  }
  0x60   :  { %750 = vperm.xlu1 %1733, %v520_v7   ;;  %745 = vperm.xlu0 %1732, %v519_v8  }
  0x61   :  { %1672 = vmatmul.mubr.bf16.gmra.mxu0 %v107_v9  ;;  %1704 = vmatmul.mubr.bf16.gmra.mxu1 %v123_v10 }
  0x62   :  { %1675 = vmatprep.mubr.bf16.mxu0 %v108_v11  ;;  %1707 = vmatprep.mubr.bf16.mxu1 %v124_v12 }
  0x64   :  { %760 = vperm.xlu1 %1733, %v522_v13   ;;  %755 = vperm.xlu0 %1732, %v521_v14  }
  0x68   :  { %770 = vperm.xlu1 %1733, %v524_v19   ;;  %765 = vperm.xlu0 %1732, %v523_v20  }
  0x69   :  { %1676 = vmatmul.mubr.bf16.gmra.mxu0 %v109_v21  ;;  %1708 = vmatmul.mubr.bf16.gmra.mxu1 %v125_v22 }
  0x6c   :  { %780 = vperm.xlu1 %1733, %v526_v23   ;;  %775 = vperm.xlu0 %1732, %v525_v24  }
  0x70   :  { %790 = vperm.xlu1 %1733, %v528_v25   ;;  %785 = vperm.xlu0 %1732, %v527_v26  }
  0x74   :  { %800 = vperm.xlu1 %1733, %v530_v27   ;;  %795 = vperm.xlu0 %1732, %v529_v28  }
  0x78   :  { %810 = vperm.xlu1 %1733, %v532_v29   ;;  %805 = vperm.xlu0 %1732, %v531_v30  }
  0x7c   :  { %820 = vperm.xlu1 %1733, %v534_v31   ;;  %815 = vperm.xlu0 %1732, %v533_v32  }
  0x80   :  { %830 = vperm.xlu1 %1733, %v536_v33   ;;  %825 = vperm.xlu0 %1732, %v535_v34  }
  0x84   :  { %840 = vperm.xlu1 %1733, %v538_v35   ;;  %835 = vperm.xlu0 %1732, %v537_v36  }
  0x88   :  { %850 = vperm.xlu1 %1733, %v540_v37   ;;  %845 = vperm.xlu0 %1732, %v539_v38  }
  0x8b   :  { %v556_v41 = vpop.permute.xlu1 %555  ;;  %v546_v42 = vpop.permute.xlu0 %545 }
  0x8c   :  { %860 = vperm.xlu1 %1733, %v542_v39   ;;  %855 = vperm.xlu0 %1732, %v541_v40  }
  0x8f   :  { %v561_v43 = vpop.permute.xlu1 %560  ;;  %v551_v44 = vpop.permute.xlu0 %550 }
  0x93   :  { %v2201_v45 = vpop.permute.xlu1 %570  ;;  %v2203_v46 = vpop.permute.xlu0 %565 }
  0x97   :  { %v2205_v47 = vpop.permute.xlu1 %580  ;;  %v2207_v48 = vpop.permute.xlu0 %575 }
  0x9b   :  { %v2209_v49 = vpop.permute.xlu1 %590  ;;  %v2211_v50 = vpop.permute.xlu0 %585 }
  0x9f   :  { %v2213_v51 = vpop.permute.xlu1 %600  ;;  %v2215_v52 = vpop.permute.xlu0 %595 }
  0xa3   :  { %v2217_v53 = vpop.permute.xlu1 %610  ;;  %v2219_v54 = vpop.permute.xlu0 %605 }
  0xa7   :  { %v2221_v55 = vpop.permute.xlu1 %620  ;;  %v2223_v56 = vpop.permute.xlu0 %615 }
  0xab   :  { %v2225_v57 = vpop.permute.xlu1 %630  ;;  %v2227_v58 = vpop.permute.xlu0 %625 }
  0xaf   :  { %v2229_v59 = vpop.permute.xlu1 %640  ;;  %v2231_v60 = vpop.permute.xlu0 %635 }
  0xb3   :  { %v2233_v61 = vpop.permute.xlu1 %650  ;;  %v2235_v62 = vpop.permute.xlu0 %645 }
  0xb7   :  { %v2237_v63 = vpop.permute.xlu1 %660  ;;  %v2239_v0 = vpop.permute.xlu0 %655 }
  0xbb   :  { %v2241_v1 = vpop.permute.xlu1 %670  ;;  %v2243_v2 = vpop.permute.xlu0 %665 }
  0xbc   :  { %2322 = vst [vmem:[#allocation8_spill] sm:$0xff] %v2241_v1  ;;  %2323 = vst [vmem:[#allocation9_spill] sm:$0xff] %v2243_v2 }
  0xbf   :  { %v2245_v3 = vpop.permute.xlu1 %680  ;;  %v2247_v4 = vpop.permute.xlu0 %675 }
  0xc3   :  { %v2249_v5 = vpop.permute.xlu1 %690  ;;  %v2251_v6 = vpop.permute.xlu0 %685 }
  0xc4   :  { %2324 = vst [vmem:[#allocation10_spill] sm:$0xff] %v2249_v5  ;;  %2325 = vst [vmem:[#allocation11_spill] sm:$0xff] %v2251_v6 }
  0xc7   :  { %v2253_v7 = vpop.permute.xlu1 %700  ;;  %v2255_v8 = vpop.permute.xlu0 %695 }
  0xc8   :  { %2326 = vst [vmem:[#allocation12_spill] sm:$0xff] %v2253_v7  ;;  %2327 = vst [vmem:[#allocation13_spill] sm:$0xff] %v2255_v8 }
  0xcb   :  { %v711_v9 = vpop.permute.xlu1 %710  ;;  %v706_v10 = vpop.permute.xlu0 %705 }
  0xcf   :  { %v721_v11 = vpop.permute.xlu1 %720  ;;  %v716_v12 = vpop.permute.xlu0 %715 }
  0xd3   :  { %v731_v13 = vpop.permute.xlu1 %730  ;;  %v726_v14 = vpop.permute.xlu0 %725 }
  0xd7   :  { %v741_v15 = vpop.permute.xlu1 %740  ;;  %v736_v16 = vpop.permute.xlu0 %735 }
  0xdb   :  { %v2257_v17 = vpop.permute.xlu1 %750  ;;  %v2259_v18 = vpop.permute.xlu0 %745 }
  0xdf   :  { %v2261_v19 = vpop.permute.xlu1 %760  ;;  %v756_v20 = vpop.permute.xlu0 %755 }
  0xe3   :  { %v2263_v27 = vpop.permute.xlu1 %770  ;;  %v2265_v28 = vpop.permute.xlu0 %765 }
  0xf1   :  { %v1649_v21 = vpop.f32.mrf.mxu0  ;;  %v1681_v22 = vpop.f32.mrf.mxu1 }
  0xf2   :  { %v865_v29 = vmul.f32 %v1649_v21, %v556_v41  ;;  %v897_v30 = vmul.f32 %v1681_v22, %v716_v12  ;;  %v2267_v41 = vpop.permute.xlu1 %780 }
  0xf3   :  { %v224_v23 = vpop.f32.mrf.mxu0  ;;  %v352_v24 = vpop.f32.mrf.mxu1 }
  0xf4   :  { %v863_v33 = vmul.f32 %v546_v42, %v224_v23  ;;  %v895_v34 = vmul.f32 %v706_v10, %v352_v24 }
  0xf5   :  { %v1650_v25 = vpop.f32.mrf.mxu0  ;;  %v1682_v26 = vpop.f32.mrf.mxu1 }
  0xf6   :  { %v866_v31 = vmul.f32 %v1650_v25, %v561_v43  ;;  %v898_v32 = vmul.f32 %v1682_v26, %v721_v11  ;;  %v776_v43 = vpop.permute.xlu0 %775 }
  0xf7   :  { %v227_v35 = vpop.f32.mrf.mxu0  ;;  %v355_v36 = vpop.f32.mrf.mxu1 }
  0xf8   :  { %v1408_v37 = vpack.c.bf16 %v866_v31, %v865_v29  ;;  %v1488_v38 = vpack.c.bf16 %v898_v32, %v897_v30  ;;  %v864_v39 = vmul.f32 %v551_v44, %v227_v35  ;;  %v896_v40 = vmul.f32 %v711_v9, %v355_v36  ;;  %v2273_v31 = vpop.permute.xlu1 %790 }
  0xf9   :  { %v1653_v5 = vpop.f32.mrf.mxu0  ;;  %v1685_v6 = vpop.f32.mrf.mxu1 }
  0xfa   :  { %1560 = vst [vmem:[#allocation5 + $0x8] sm:$0xff] %v1408_v37   ;;  %1576 = vst [vmem:[#allocation5 + $0x88] sm:$0xff] %v1488_v38   ;;  %v1403_v7 = vpack.c.bf16 %v864_v39, %v863_v33  ;;  %v1483_v8 = vpack.c.bf16 %v896_v40, %v895_v34  ;;  %v869_v11 = vmul.f32 %v1653_v5, %v2207_v48  ;;  %v2275_v32 = vpop.permute.xlu0 %785 }
  0xfb   :  { %v240_v1 = vpop.f32.mrf.mxu0  ;;  %v368_v2 = vpop.f32.mrf.mxu1  ;;  %v901_v12 = vmul.f32 %v1685_v6, %v736_v16 }
  0xfc   :  { %1404 = vst [vmem:[#allocation5] sm:$0xff] %v1403_v7   ;;  %1575 = vst [vmem:[#allocation5 + $0x80] sm:$0xff] %v1483_v8   ;;  %v867_v21 = vmul.f32 %v2203_v46, %v240_v1  ;;  %v899_v22 = vmul.f32 %v726_v14, %v368_v2  ;;  %v801_v35 = vpop.permute.xlu1 %800 }
  0xfd   :  { %v1654_v42 = vpop.f32.mrf.mxu0  ;;  %v1686_v10 = vpop.f32.mrf.mxu1 }
  0xfe   :  { %v870_v44 = vmul.f32 %v1654_v42, %v2205_v47  ;;  %v902_v9 = vmul.f32 %v1686_v10, %v741_v15  ;;  %v796_v36 = vpop.permute.xlu0 %795 }
  0xff   :  { %v243_v23 = vpop.f32.mrf.mxu0  ;;  %v371_v24 = vpop.f32.mrf.mxu1 }
 0x100   :  { %v1418_v25 = vpack.c.bf16 %v870_v44, %v869_v11  ;;  %v1498_v26 = vpack.c.bf16 %v902_v9, %v901_v12  ;;  %v868_v29 = vmul.f32 %v2201_v45, %v243_v23  ;;  %v900_v30 = vmul.f32 %v731_v13, %v371_v24  ;;  %v2284_v11 = vpop.permute.xlu1 %810 }
 0x101   :  { %v1657_v7 = vpop.f32.mrf.mxu0  ;;  %v1689_v8 = vpop.f32.mrf.mxu1 }
 0x102   :  { %1562 = vst [vmem:[#allocation5 + $0x18] sm:$0xff] %v1418_v25   ;;  %1578 = vst [vmem:[#allocation5 + $0x98] sm:$0xff] %v1498_v26   ;;  %v1413_v47 = vpack.c.bf16 %v868_v29, %v867_v21  ;;  %v1493_v48 = vpack.c.bf16 %v900_v30, %v899_v22  ;;  %v873_v6 = vmul.f32 %v1657_v7, %v2215_v52  ;;  %v806_v12 = vpop.permute.xlu0 %805 }
 0x103   :  { %v256_v5 = vpop.f32.mrf.mxu0  ;;  %v384_v46 = vpop.f32.mrf.mxu1  ;;  %v905_v45 = vmul.f32 %v1689_v8, %v756_v20 }
 0x104   :  { %1561 = vst [vmem:[#allocation5 + $0x10] sm:$0xff] %v1413_v47   ;;  %1577 = vst [vmem:[#allocation5 + $0x90] sm:$0xff] %v1493_v48   ;;  %v871_v15 = vmul.f32 %v2211_v50, %v256_v5  ;;  %v903_v16 = vmul.f32 %v2259_v18, %v384_v46  ;;  %v821_v47 = vpop.permute.xlu1 %820 }
 0x105   :  { %v1658_v1 = vpop.f32.mrf.mxu0  ;;  %v1690_v2 = vpop.f32.mrf.mxu1 }
 0x106   :  { %v874_v13 = vmul.f32 %v1658_v1, %v2213_v51  ;;  %v906_v14 = vmul.f32 %v1690_v2, %v2261_v19 }
 0x107   :  { %v259_v33 = vpop.f32.mrf.mxu0  ;;  %v387_v34 = vpop.f32.mrf.mxu1 }
 0x108   :  { %v1428_v37 = vpack.c.bf16 %v874_v13, %v873_v6  ;;  %v1508_v38 = vpack.c.bf16 %v906_v14, %v905_v45  ;;  %v872_v39 = vmul.f32 %v2209_v49, %v259_v33  ;;  %v904_v40 = vmul.f32 %v2257_v17, %v387_v34 }
 0x109   :  { %v1661_v52 = vpop.f32.mrf.mxu0  ;;  %v1693_v20 = vpop.f32.mrf.mxu1 }
 0x10a   :  { %1564 = vst [vmem:[#allocation5 + $0x28] sm:$0xff] %v1428_v37   ;;  %1580 = vst [vmem:[#allocation5 + $0xa8] sm:$0xff] %v1508_v38   ;;  %v1423_v51 = vpack.c.bf16 %v872_v39, %v871_v15  ;;  %v1503_v19 = vpack.c.bf16 %v904_v40, %v903_v16  ;;  %v877_v44 = vmul.f32 %v1661_v52, %v2223_v56  ;;  %v831_v37 = vpop.permute.xlu1 %830 }
 0x10b   :  { %v272_v42 = vpop.f32.mrf.mxu0  ;;  %v400_v50 = vpop.f32.mrf.mxu1  ;;  %v909_v49 = vmul.f32 %v1693_v20, %v776_v43 }
 0x10c   :  { %1563 = vst [vmem:[#allocation5 + $0x20] sm:$0xff] %v1423_v51   ;;  %1579 = vst [vmem:[#allocation5 + $0xa0] sm:$0xff] %v1503_v19   ;;  %v875_v21 = vmul.f32 %v2219_v54, %v272_v42  ;;  %v907_v22 = vmul.f32 %v2265_v28, %v400_v50  ;;  %v816_v54 = vpop.permute.xlu0 %815 }
 0x10d   :  { %v1662_v18 = vpop.f32.mrf.mxu0  ;;  %v1694_v10 = vpop.f32.mrf.mxu1 }
 0x10e   :  { %v878_v17 = vmul.f32 %v1662_v18, %v2221_v55  ;;  %v910_v9 = vmul.f32 %v1694_v10, %v2267_v41  ;;  %v841_v42 = vpop.permute.xlu1 %840 }
 0x10f   :  { %v275_v23 = vpop.f32.mrf.mxu0  ;;  %v403_v24 = vpop.f32.mrf.mxu1 }
 0x110   :  { %v1438_v25 = vpack.c.bf16 %v878_v17, %v877_v44  ;;  %v1518_v26 = vpack.c.bf16 %v910_v9, %v909_v49  ;;  %v876_v29 = vmul.f32 %v2217_v53, %v275_v23  ;;  %v908_v30 = vmul.f32 %v2263_v27, %v403_v24 }
 0x111   :  { %v1665_v7 = vpop.f32.mrf.mxu0  ;;  %v1697_v8 = vpop.f32.mrf.mxu1 }
 0x112   :  { %1566 = vst [vmem:[#allocation5 + $0x38] sm:$0xff] %v1438_v25   ;;  %1582 = vst [vmem:[#allocation5 + $0xb8] sm:$0xff] %v1518_v26   ;;  %v1433_v56 = vpack.c.bf16 %v876_v29, %v875_v21  ;;  %v1513_v55 = vpack.c.bf16 %v908_v30, %v907_v22  ;;  %v881_v5 = vmul.f32 %v1665_v7, %v2231_v60  ;;  %v826_v60 = vpop.permute.xlu0 %825  ;;  %v851_v23 = vpop.permute.xlu1 %850  ;;  %v2328_v29 = vld [vmem:[#allocation9_spill] sm:$0xff] }
 0x113   :  { %v288_v43 = vpop.f32.mrf.mxu0  ;;  %v416_v41 = vpop.f32.mrf.mxu1  ;;  %v913_v46 = vmul.f32 %v1697_v8, %v796_v36 }
 0x114   :  { %1565 = vst [vmem:[#allocation5 + $0x30] sm:$0xff] %v1433_v56   ;;  %1581 = vst [vmem:[#allocation5 + $0xb0] sm:$0xff] %v1513_v55   ;;  %v879_v1 = vmul.f32 %v2227_v58, %v288_v43  ;;  %v911_v2 = vmul.f32 %v2275_v32, %v416_v41  ;;  %v2329_v41 = vld [vmem:[#allocation8_spill] sm:$0xff] }
 0x115   :  { %v1666_v28 = vpop.f32.mrf.mxu0  ;;  %v1698_v48 = vpop.f32.mrf.mxu1 }
 0x116   :  { %v882_v53 = vmul.f32 %v1666_v28, %v2229_v59  ;;  %v914_v27 = vmul.f32 %v1698_v48, %v801_v35  ;;  %v836_v50 = vpop.permute.xlu0 %835 }
 0x117   :  { %v291_v6 = vpop.f32.mrf.mxu0  ;;  %v419_v45 = vpop.f32.mrf.mxu1 }
 0x118   :  { %v1448_v13 = vpack.c.bf16 %v882_v53, %v881_v5  ;;  %v1528_v14 = vpack.c.bf16 %v914_v27, %v913_v46  ;;  %v880_v15 = vmul.f32 %v2225_v57, %v291_v6  ;;  %v912_v16 = vmul.f32 %v2273_v31, %v419_v45  ;;  %v2330_v6 = vld [vmem:[#allocation13_spill] sm:$0xff] }
 0x119   :  { %v1669_v33 = vpop.f32.mrf.mxu0  ;;  %v1701_v34 = vpop.f32.mrf.mxu1 }
 0x11a   :  { %1568 = vst [vmem:[#allocation5 + $0x48] sm:$0xff] %v1448_v13   ;;  %1584 = vst [vmem:[#allocation5 + $0xc8] sm:$0xff] %v1528_v14   ;;  %v1443_v59 = vpack.c.bf16 %v880_v15, %v879_v1  ;;  %v1523_v35 = vpack.c.bf16 %v912_v16, %v911_v2  ;;  %v885_v39 = vmul.f32 %v1669_v33, %v2239_v0  ;;  %v846_v24 = vpop.permute.xlu0 %845  ;;  %v2331_v14 = vld [vmem:[#allocation12_spill] sm:$0xff]  ;;  %v2332_v33 = vld [vmem:[#allocation11_spill] sm:$0xff] }
 0x11b   :  { %v304_v36 = vpop.f32.mrf.mxu0  ;;  %v432_v58 = vpop.f32.mrf.mxu1  ;;  %v917_v40 = vmul.f32 %v1701_v34, %v816_v54 }
 0x11c   :  { %1567 = vst [vmem:[#allocation5 + $0x40] sm:$0xff] %v1443_v59   ;;  %1583 = vst [vmem:[#allocation5 + $0xc0] sm:$0xff] %v1523_v35   ;;  %v883_v52 = vmul.f32 %v2235_v62, %v304_v36  ;;  %v915_v20 = vmul.f32 %v806_v12, %v432_v58  ;;  %v2333_v58 = vld [vmem:[#allocation10_spill] sm:$0xff] }
 0x11d   :  { %v1670_v32 = vpop.f32.mrf.mxu0  ;;  %v1702_v38 = vpop.f32.mrf.mxu1 }
 0x11e   :  { %v886_v57 = vmul.f32 %v1670_v32, %v2237_v63  ;;  %v918_v31 = vmul.f32 %v1702_v38, %v821_v47  ;;  %v856_v27 = vpop.permute.xlu0 %855 }
 0x11f   :  { %v307_v51 = vpop.f32.mrf.mxu0  ;;  %v435_v19 = vpop.f32.mrf.mxu1 }
 0x120   :  { %v1458_v18 = vpack.c.bf16 %v886_v57, %v885_v39  ;;  %v1538_v10 = vpack.c.bf16 %v918_v31, %v917_v40  ;;  %v884_v44 = vmul.f32 %v2233_v61, %v307_v51  ;;  %v916_v49 = vmul.f32 %v2284_v11, %v435_v19 }
 0x121   :  { %v1673_v17 = vpop.f32.mrf.mxu0  ;;  %v1705_v9 = vpop.f32.mrf.mxu1 }
 0x122   :  { %1570 = vst [vmem:[#allocation5 + $0x58] sm:$0xff] %v1458_v18   ;;  %1586 = vst [vmem:[#allocation5 + $0xd8] sm:$0xff] %v1538_v10   ;;  %v1453_v0 = vpack.c.bf16 %v884_v44, %v883_v52  ;;  %v1533_v63 = vpack.c.bf16 %v916_v49, %v915_v20  ;;  %v889_v25 = vmul.f32 %v1673_v17, %v2247_v4 }
 0x123   :  { %v320_v21 = vpop.f32.mrf.mxu0  ;;  %v448_v22 = vpop.f32.mrf.mxu1  ;;  %v921_v26 = vmul.f32 %v1705_v9, %v836_v50 }
 0x124   :  { %1569 = vst [vmem:[#allocation5 + $0x50] sm:$0xff] %v1453_v0   ;;  %1585 = vst [vmem:[#allocation5 + $0xd0] sm:$0xff] %v1533_v63   ;;  %v887_v30 = vmul.f32 %v2328_v29, %v320_v21  ;;  %v919_v7 = vmul.f32 %v826_v60, %v448_v22 }
 0x125   :  { %v1674_v62 = vpop.f32.mrf.mxu0  ;;  %v1706_v12 = vpop.f32.mrf.mxu1 }
 0x126   :  { %v890_v61 = vmul.f32 %v1674_v62, %v2245_v3  ;;  %v922_v11 = vmul.f32 %v1706_v12, %v841_v42  ;;  %v861_v3 = vpop.permute.xlu1 %860 }
 0x127   :  { %v323_v8 = vpop.f32.mrf.mxu0  ;;  %v451_v56 = vpop.f32.mrf.mxu1 }
 0x128   :  { %v1468_v55 = vpack.c.bf16 %v890_v61, %v889_v25  ;;  %v1548_v43 = vpack.c.bf16 %v922_v11, %v921_v26  ;;  %v888_v47 = vmul.f32 %v2329_v41, %v323_v8  ;;  %v920_v54 = vmul.f32 %v831_v37, %v451_v56 }
 0x129   :  { %v1677_v28 = vpop.f32.mrf.mxu0  ;;  %v1709_v48 = vpop.f32.mrf.mxu1 }
 0x12a   :  { %1572 = vst [vmem:[#allocation5 + $0x68] sm:$0xff] %v1468_v55   ;;  %1588 = vst [vmem:[#allocation5 + $0xe8] sm:$0xff] %v1548_v43   ;;  %v1463_v5 = vpack.c.bf16 %v888_v47, %v887_v30  ;;  %v1543_v4 = vpack.c.bf16 %v920_v54, %v919_v7  ;;  %v893_v45 = vmul.f32 %v1677_v28, %v2330_v6 }
 0x12b   :  { %v336_v46 = vpop.f32.mrf.mxu0  ;;  %v464_v53 = vpop.f32.mrf.mxu1  ;;  %v925_v13 = vmul.f32 %v1709_v48, %v856_v27 }
 0x12c   :  { %1571 = vst [vmem:[#allocation5 + $0x60] sm:$0xff] %v1463_v5   ;;  %1587 = vst [vmem:[#allocation5 + $0xe0] sm:$0xff] %v1543_v4   ;;  %v891_v34 = vmul.f32 %v2332_v33, %v336_v46  ;;  %v923_v37 = vmul.f32 %v846_v24, %v464_v53 }
 0x12d   :  { %v1678_v1 = vpop.f32.mrf.mxu0  ;;  %v1710_v2 = vpop.f32.mrf.mxu1 }
 0x12e   :  { %v894_v15 = vmul.f32 %v1678_v1, %v2331_v14  ;;  %v926_v16 = vmul.f32 %v1710_v2, %v861_v3 }
 0x12f   :  { %v339_v60 = vpop.f32.mrf.mxu0  ;;  %v467_v59 = vpop.f32.mrf.mxu1 }
 0x130   :  { %v1478_v35 = vpack.c.bf16 %v894_v15, %v893_v45  ;;  %v1558_v36 = vpack.c.bf16 %v926_v16, %v925_v13  ;;  %v892_v32 = vmul.f32 %v2333_v58, %v339_v60  ;;  %v924_v38 = vmul.f32 %v851_v23, %v467_v59 }
 0x132   :  { %1574 = vst [vmem:[#allocation5 + $0x78] sm:$0xff] %v1478_v35   ;;  %1590 = vst [vmem:[#allocation5 + $0xf8] sm:$0xff] %v1558_v36   ;;  %v1473_v39 = vpack.c.bf16 %v892_v32, %v891_v34  ;;  %v1553_v40 = vpack.c.bf16 %v924_v38, %v923_v37 }
 0x134   :  { %1573 = vst [vmem:[#allocation5 + $0x70] sm:$0xff] %v1473_v39   ;;  %1589 = vst [vmem:[#allocation5 + $0xf0] sm:$0xff] %v1553_v40  }
 0x135   :  { %1773 = shalt.err (!%p1770_p9)
}
 0x136   :  { %1258 = dma.vmem_to_hbm [thread:$0]  %s1253_s11, 4096, %s2321_s3, [#allocation4], %s1787_s15, %s1787_s15, %s1788_s16  }
 0x137   :  { %1784 = dma.done.wait [#allocation4], 4096  }
 0x138   :  { %1785 = vsyncadd [#allocation4], 4294963200 }
 0x139   :  { %1262 = vsyncpa [#allocation3], 1 }
 0x13a   :  { %1263 = vsyncpa [#allocation4], 1 }

</bundles_post_ra>
